<compile_context>
chip_gen: v7x
topology: tpu7x:2x2x1
jax: 0.10.0
libtpu: 0.0.40
codegen_flags: <defaults>
</compile_context>

<pallas_src>
import jax
import jax.numpy as jnp
from jax.experimental import pallas as pl
from jax.experimental.pallas import tpu as pltpu


# Max rows per batch tile. VMEM math: x block (tm, 4) f32 lane-pads to (tm, 128) ->
# tm*512 B per buffer, x2 double-buffered; plus (tm, 32) f32 intermediates. At
# tm=8192 that is ~8 MiB of x buffers + ~3 MiB of temporaries: safe under the 32 MiB
# default scoped VMEM limit on every generation (incl. v7x with 64 MiB physical).
_TM_MAX = 8192


def _mlp_kernel(x_ref, w1_ref, b1_ref, w2_ref, b2_ref, w3t_ref, b3t_ref, ot_ref):
    # Cast matmul inputs to the weight dtype (no-op in f32 mode, bf16 otherwise).
    x = x_ref[...].astype(w1_ref.dtype)
    # 1/scale is already folded into w1 by the wrapper.
    h1 = jnp.dot(x, w1_ref[...], preferred_element_type=jnp.float32) + b1_ref[...]
    h1 = jnp.maximum(h1, 0.0)                                   # ReLU (f32)
    h2 = jnp.dot(h1.astype(w2_ref.dtype), w2_ref[...],
                 preferred_element_type=jnp.float32) + b2_ref[...]
    h2 = jnp.maximum(h2, 0.0)                                   # ReLU (f32)
    # Final layer in transposed form: (action, hidden) . (tm, hidden)^T -> (action, tm).
    # Keeps the output store lane-dense (tm lanes wide) instead of tm masked
    # 2-lane partial stores; the contraction-on-minor-dims pattern is the same one
    # flash attention uses and lowers straight onto the MXU (any needed operand
    # transpose rides the XLU slot).
    out_t = jax.lax.dot_general(
        w3t_ref[...], h2.astype(w3t_ref.dtype),
        dimension_numbers=(((1,), (1,)), ((), ())),
        preferred_element_type=jnp.float32) + b3t_ref[...]
    ot_ref[...] = out_t.astype(ot_ref.dtype)


def _min_grid_steps():
    """Return 2 on devices with 2 TensorCores (v7x; also v4/v5p megacore) so the
    "parallel" batch axis shards across both cores; 1 on v5e/v6e."""
    try:
        kind = jax.devices()[0].device_kind.lower()
    except Exception:
        return 1
    if ("v7" in kind) or ("7x" in kind) or ("v4" in kind) or ("v5p" in kind):
        return 2
    return 1


def _pick_tm(batch, *, min_steps=1):
    """Pick the batch tile: as large as possible (fewest grid steps) subject to
      * tm divides batch,
      * tm == batch (block == full array, always layout-legal) or tm % 128 == 0
        (lane dim of the transposed (action, tm) output block),
      * tm <= _TM_MAX (VMEM budget for the 32x lane-padded x block),
      * at least `min_steps` grid steps when a legal split exists (v7x: use both TCs).
    """
    if min_steps <= 1 and batch <= _TM_MAX:
        return batch
    cap = min(batch // max(min_steps, 1), _TM_MAX)
    best = None
    d = 128
    while d <= cap:
        if batch % d == 0:
            best = d
        d += 128
    if best is not None:
        return best
    # No legal multi-step tiling (tiny or oddly-sized batch): single full-batch block.
    return batch


def net_forward(x, params, scale, *, compute_dtype=jnp.float32, tm=None):
    """Pallas forward for Net. x: (B, state_dim) f32. Returns (B, action_dim) f32.

    compute_dtype=jnp.bfloat16 runs the matmuls in bf16 with f32 MXU accumulation;
    valid on v5e/v6e/v7x (all have bf16-native MXUs); bias-add/ReLU stay f32.
    """
    w1, b1, w2, b2, w3, b3 = params
    B, state_dim = x.shape
    hidden_dim = w1.shape[1]
    action_dim = w3.shape[1]

    # Fold x/scale into the first-layer weight (done once, outside the kernel).
    w1 = (w1 * (1.0 / float(scale))).astype(compute_dtype)
    w2 = w2.astype(compute_dtype)
    # Final layer pre-transposed to (action, hidden) for the lane-dense output block.
    w3t = jnp.transpose(w3).astype(compute_dtype)
    # Biases stay f32: they are added to the f32 MXU accumulators.
    b1 = b1.astype(jnp.float32)
    b2 = b2.astype(jnp.float32)
    b3t = jnp.reshape(b3, (action_dim, 1)).astype(jnp.float32)

    if tm is None:
        tm = _pick_tm(B, min_steps=_min_grid_steps())
    if B % tm != 0:
        raise ValueError(f"tm={tm} must divide batch={B} (tail rows would be dropped)")
    if tm != B and tm % 128 != 0:
        raise ValueError(
            f"tm={tm} must be a multiple of 128 (or equal to the batch) for the "
            "lane-dense transposed output block")
    grid = (B // tm,)

    x_spec = pl.BlockSpec((tm, state_dim), lambda i: (i, 0))
    # Transposed, lane-dense output: (action_dim, tm) block marching along lanes.
    out_spec = pl.BlockSpec((action_dim, tm), lambda i: (0, i))
    # Weights/biases: same block every grid step -> VMEM-resident, no re-DMA.
    resident = lambda a: pl.BlockSpec(a.shape, lambda i: (0,) * a.ndim)

    flops = 2 * B * (state_dim * hidden_dim + hidden_dim * hidden_dim
                     + hidden_dim * action_dim)
    bytes_accessed = int(
        x.size * x.dtype.itemsize
        + B * action_dim * 4
        + sum(a.size * a.dtype.itemsize for a in (w1, b1, w2, b2, w3t, b3t)))
    cost = pl.CostEstimate(flops=flops, transcendentals=0,
                           bytes_accessed=bytes_accessed)

    out_t = pl.pallas_call(
        _mlp_kernel,
        out_shape=jax.ShapeDtypeStruct((action_dim, B), jnp.float32),
        grid=grid,
        in_specs=[x_spec,
                  resident(w1), resident(b1),
                  resident(w2), resident(b2),
                  resident(w3t), resident(b3t)],
        out_specs=out_spec,
        compiler_params=pltpu.CompilerParams(dimension_semantics=("parallel",)),
        cost_estimate=cost,
    )(x, w1, b1, w2, b2, w3t, b3t)

    # Tiny (action_dim, B) -> (B, action_dim) transpose outside the kernel.
    return out_t.T


def init_params(key, state_dim, hidden_dim, action_dim):
    """Deterministic kaiming-style init (matches kaiming_init: normal weights, zero bias)."""
    k1, k2, k3 = jax.random.split(key, 3)

    def kaiming(k, fan_in, fan_out):
        std = jnp.sqrt(2.0 / fan_in)
        # stored as (in, out) = transpose of torch's (out, in)
        return jax.random.normal(k, (fan_in, fan_out), dtype=jnp.float32) * std

    w1 = kaiming(k1, state_dim, hidden_dim)
    b1 = jnp.zeros((1, hidden_dim), jnp.float32)
    w2 = kaiming(k2, hidden_dim, hidden_dim)
    b2 = jnp.zeros((1, hidden_dim), jnp.float32)
    w3 = kaiming(k3, hidden_dim, action_dim)
    b3 = jnp.zeros((1, action_dim), jnp.float32)
    return (w1, b1, w2, b2, w3, b3)


def net_forward_ref(x, params, scale):
    """Plain-JAX reference for correctness check."""
    w1, b1, w2, b2, w3, b3 = params
    x = x / scale
    h1 = jnp.maximum(x @ w1 + b1, 0.0)
    h2 = jnp.maximum(h1 @ w2 + b2, 0.0)
    return h2 @ w3 + b3


if __name__ == "__main__":
    # Shapes consistent with the DQN Net: state=4, hidden=32, action=2.
    state_dim, hidden_dim, action_dim = 4, 32, 2
    scale = 10.0

    key = jax.random.PRNGKey(0)
    kx, kp, kx2 = jax.random.split(key, 3)
    params = init_params(kp, state_dim, hidden_dim, action_dim)

    # --- small batch: auto tile selection (single step on 1-TC chips) ---
    batch = 64
    x = jax.random.normal(kx, (batch, state_dim), dtype=jnp.float32)
    ref = net_forward_ref(x, params, scale)

    out_f32 = jax.block_until_ready(net_forward(x, params, scale))
    assert out_f32.shape == (batch, action_dim)
    assert jnp.allclose(out_f32, ref, atol=1e-5, rtol=1e-5), "f32 mismatch vs reference"

    # bf16-weights / f32-accumulate path (bf16-native MXU on v5e/v6e/v7x).
    out_bf16 = jax.block_until_ready(
        net_forward(x, params, scale, compute_dtype=jnp.bfloat16))
    assert out_bf16.shape == (batch, action_dim)
    assert jnp.allclose(out_bf16, ref, atol=2e-2, rtol=2e-2), "bf16 mismatch vs reference"

    # --- multi-step grid: exercises the 128-aligned batch tiling and the moving
    #     lane index of the transposed lane-dense output block ---
    batch2 = 512
    x2 = jax.random.normal(kx2, (batch2, state_dim), dtype=jnp.float32)
    ref2 = net_forward_ref(x2, params, scale)
    out2 = jax.block_until_ready(net_forward(x2, params, scale, tm=128))
    assert out2.shape == (batch2, action_dim)
    assert jnp.allclose(out2, ref2, atol=1e-5, rtol=1e-5), "multi-step mismatch vs reference"

    print("KERNEL_OK")
</pallas_src>

<mosaic_0001>
module attributes {stable_mosaic.version = 11 : i64} {
  func.func @_mlp_kernel(%arg0: i32, %arg1: memref<64x4xf32, #tpu.memory_space<vmem>>, %arg2: memref<4x32xf32, #tpu.memory_space<vmem>>, %arg3: memref<1x32xf32, #tpu.memory_space<vmem>>, %arg4: memref<32x32xf32, #tpu.memory_space<vmem>>, %arg5: memref<1x32xf32, #tpu.memory_space<vmem>>, %arg6: memref<2x32xf32, #tpu.memory_space<vmem>>, %arg7: memref<2x1xf32, #tpu.memory_space<vmem>>, %arg8: memref<2x64xf32, #tpu.memory_space<vmem>>) attributes {dimension_semantics = [#tpu.dimension_semantics<parallel>], iteration_bounds = array<i64: 1>, scalar_prefetch = 0 : i64, scratch_operands = 0 : i64, tpu.core_type = #tpu.core_type<tc>, window_params = [{transform_indices = @transform_0, window_bounds = array<i64: 64, 4>}, {pipeline_mode = #tpu.pipeline_mode<synchronous>, transform_indices = @transform_1, window_bounds = array<i64: 4, 32>}, {pipeline_mode = #tpu.pipeline_mode<synchronous>, transform_indices = @transform_2, window_bounds = array<i64: 1, 32>}, {pipeline_mode = #tpu.pipeline_mode<synchronous>, transform_indices = @transform_3, window_bounds = array<i64: 32, 32>}, {pipeline_mode = #tpu.pipeline_mode<synchronous>, transform_indices = @transform_4, window_bounds = array<i64: 1, 32>}, {pipeline_mode = #tpu.pipeline_mode<synchronous>, transform_indices = @transform_5, window_bounds = array<i64: 2, 32>}, {pipeline_mode = #tpu.pipeline_mode<synchronous>, transform_indices = @transform_6, window_bounds = array<i64: 2, 1>}, {transform_indices = @transform_7, window_bounds = array<i64: 2, 64>}]} {
    %c0 = arith.constant 0 : index
    %c0_0 = arith.constant 0 : index
    %0 = vector.load %arg1[%c0, %c0_0] : memref<64x4xf32, #tpu.memory_space<vmem>>, vector<64x4xf32>
    %c0_1 = arith.constant 0 : index
    %c0_2 = arith.constant 0 : index
    %1 = vector.load %arg2[%c0_1, %c0_2] : memref<4x32xf32, #tpu.memory_space<vmem>>, vector<4x32xf32>
    %cst = arith.constant dense<0.000000e+00> : vector<64x32xf32>
    %2 = tpu.matmul %0, %1, %cst {dimension_numbers = #tpu.dot_dimension_numbers<[1], [0], [0], [1], [0, 0, 1, 1], [], []>} : vector<64x4xf32>, vector<4x32xf32>, vector<64x32xf32> -> vector<64x32xf32>
    %c0_3 = arith.constant 0 : index
    %c0_4 = arith.constant 0 : index
    %3 = vector.load %arg3[%c0_3, %c0_4] : memref<1x32xf32, #tpu.memory_space<vmem>>, vector<1x32xf32>
    %4 = vector.broadcast %3 : vector<1x32xf32> to vector<64x32xf32>
    %5 = arith.addf %2, %4 : vector<64x32xf32>
    %cst_5 = arith.constant 0.000000e+00 : f32
    %6 = vector.broadcast %cst_5 : f32 to vector<64x32xf32>
    %7 = arith.maximumf %5, %6 : vector<64x32xf32>
    %c0_6 = arith.constant 0 : index
    %c0_7 = arith.constant 0 : index
    %8 = vector.load %arg4[%c0_6, %c0_7] : memref<32x32xf32, #tpu.memory_space<vmem>>, vector<32x32xf32>
    %cst_8 = arith.constant dense<0.000000e+00> : vector<64x32xf32>
    %9 = tpu.matmul %7, %8, %cst_8 {dimension_numbers = #tpu.dot_dimension_numbers<[1], [0], [0], [1], [0, 0, 1, 1], [], []>} : vector<64x32xf32>, vector<32x32xf32>, vector<64x32xf32> -> vector<64x32xf32>
    %c0_9 = arith.constant 0 : index
    %c0_10 = arith.constant 0 : index
    %10 = vector.load %arg5[%c0_9, %c0_10] : memref<1x32xf32, #tpu.memory_space<vmem>>, vector<1x32xf32>
    %11 = vector.broadcast %10 : vector<1x32xf32> to vector<64x32xf32>
    %12 = arith.addf %9, %11 : vector<64x32xf32>
    %cst_11 = arith.constant 0.000000e+00 : f32
    %13 = vector.broadcast %cst_11 : f32 to vector<64x32xf32>
    %14 = arith.maximumf %12, %13 : vector<64x32xf32>
    %c0_12 = arith.constant 0 : index
    %c0_13 = arith.constant 0 : index
    %15 = vector.load %arg6[%c0_12, %c0_13] : memref<2x32xf32, #tpu.memory_space<vmem>>, vector<2x32xf32>
    %cst_14 = arith.constant dense<0.000000e+00> : vector<2x64xf32>
    %16 = tpu.matmul %15, %14, %cst_14 {dimension_numbers = #tpu.dot_dimension_numbers<[1], [1], [0], [0], [0, 0, 1, 0], [], []>} : vector<2x32xf32>, vector<64x32xf32>, vector<2x64xf32> -> vector<2x64xf32>
    %c0_15 = arith.constant 0 : index
    %c0_16 = arith.constant 0 : index
    %17 = vector.load %arg7[%c0_15, %c0_16] : memref<2x1xf32, #tpu.memory_space<vmem>>, vector<2x1xf32>
    %18 = vector.broadcast %17 : vector<2x1xf32> to vector<2x64xf32>
    %19 = arith.addf %16, %18 : vector<2x64xf32>
    %c0_17 = arith.constant 0 : index
    %c0_18 = arith.constant 0 : index
    %20 = vector.load %arg8[%c0_17, %c0_18] : memref<2x64xf32, #tpu.memory_space<vmem>>, vector<2x64xf32>
    tpu.vector_store %arg8[%c0_17, %c0_18], %19 {strides = array<i32>} : memref<2x64xf32, #tpu.memory_space<vmem>>, vector<2x64xf32>,
    return
  }
  func.func @transform_0(%arg0: i32) -> (i32, i32) {
    %c0_i32 = arith.constant 0 : i32
    %c0_i32_0 = arith.constant 0 : i32
    return %arg0, %c0_i32 : i32, i32
  }
  func.func @transform_1(%arg0: i32) -> (i32, i32) {
    %c0_i32 = arith.constant 0 : i32
    %c0_i32_0 = arith.constant 0 : i32
    %c0_i32_1 = arith.constant 0 : i32
    return %c0_i32, %c0_i32_0 : i32, i32
  }
  func.func @transform_2(%arg0: i32) -> (i32, i32) {
    %c0_i32 = arith.constant 0 : i32
    %c0_i32_0 = arith.constant 0 : i32
    %c0_i32_1 = arith.constant 0 : i32
    return %c0_i32, %c0_i32_0 : i32, i32
  }
  func.func @transform_3(%arg0: i32) -> (i32, i32) {
    %c0_i32 = arith.constant 0 : i32
    %c0_i32_0 = arith.constant 0 : i32
    %c0_i32_1 = arith.constant 0 : i32
    return %c0_i32, %c0_i32_0 : i32, i32
  }
  func.func @transform_4(%arg0: i32) -> (i32, i32) {
    %c0_i32 = arith.constant 0 : i32
    %c0_i32_0 = arith.constant 0 : i32
    %c0_i32_1 = arith.constant 0 : i32
    return %c0_i32, %c0_i32_0 : i32, i32
  }
  func.func @transform_5(%arg0: i32) -> (i32, i32) {
    %c0_i32 = arith.constant 0 : i32
    %c0_i32_0 = arith.constant 0 : i32
    %c0_i32_1 = arith.constant 0 : i32
    return %c0_i32, %c0_i32_0 : i32, i32
  }
  func.func @transform_6(%arg0: i32) -> (i32, i32) {
    %c0_i32 = arith.constant 0 : i32
    %c0_i32_0 = arith.constant 0 : i32
    %c0_i32_1 = arith.constant 0 : i32
    return %c0_i32, %c0_i32_0 : i32, i32
  }
  func.func @transform_7(%arg0: i32) -> (i32, i32) {
    %c0_i32 = arith.constant 0 : i32
    %c0_i32_0 = arith.constant 0 : i32
    return %c0_i32, %arg0 : i32, i32
  }
}

</mosaic_0001>

<bundles_post_ra>
// kernel: tpu_custom_call.1
= control target key start
LH: loop header
LB: loop body
LE: loop exit
PB: predicated region body
PF: predicated region fallthrough
CT: control target
= control target key end

     0   :  { %vm68_vm0 = vcmask 1043456   ;;  %vm43_vm1 = vcmask 31744   ;;  %s758_s0 = inlined_call_operand.vmem [shape: f32[64,4], index: 0, kind: input, shape index: {}]   ;;  %s759_s1 = inlined_call_operand.vmem [shape: f32[4,32], index: 1, kind: input, shape index: {}]   ;;  %s760_s2 = inlined_call_operand.vmem [shape: f32[1,32], index: 2, kind: input, shape index: {}]   ;;  %s761_s3 = inlined_call_operand.vmem [shape: f32[32,32], index: 3, kind: input, shape index: {}]   ;;  %s762_s4 = inlined_call_operand.vmem [shape: f32[1,32], index: 4, kind: input, shape index: {}]   ;;  %s763_s5 = inlined_call_operand.vmem [shape: f32[2,32], index: 5, kind: input, shape index: {}]   ;;  %s764_s6 = inlined_call_operand.vmem [shape: f32[2,1], index: 6, kind: input, shape index: {}]   ;;  %s765_s7 = inlined_call_operand.hbm [shape: f32[2,64], index: 7, kind: output, shape index: {}]  }
   0x1   :  { %v35_v0 = vld [vmem:[%s759_s1] sm:$0xf]  ;;  %v28_v2 = vld [vmem:[%s758_s0 + $0x8] sm:$0xff]  ;;  %v29_v3 = vld [vmem:[%s758_s0 + $0x10] sm:$0xff] }
   0x2   :  { %v27_v1 = vld [vmem:[%s758_s0] sm:$0xff]  ;;  %512 = vmatprep.subr.msk.mxu1 %vm68_vm0, %v35_v0  ;;  %v186_v5 = vld [vmem:[%s761_s3 + $0x8] sm:$0xff]  ;;  %v187_v6 = vld [vmem:[%s761_s3 + $0x10] sm:$0xff] }
   0x3   :  { %514 = vmatprep.mubr.msk.f32.mxu1 %vm43_vm1, %v27_v1  ;;  %513 = vmatpush3.msk.msra.mxu1 %vm68_vm0, %v35_v0  ;;  %v185_v4 = vld [vmem:[%s761_s3] sm:$0xff]  ;;  %v30_v7 = vld [vmem:[%s758_s0 + $0x18] sm:$0xff] }
   0x4   :  { %515 = vmatmul.mubr.msk.f32.vlgmr.msra.gmra.mrb[0].mxu1 %vm43_vm1, %v28_v2  ;;  %v565_v8 = vpack.c.bf16 %v186_v5, %v185_v4  ;;  %v188_v9 = vld [vmem:[%s761_s3 + $0x18] sm:$0xff] }
   0x5   :  { %517 = vmatprep.mubr.msk.f32.mxu1 %vm43_vm1, %v29_v3 }
   0x6   :  { %12 = vsyncpa [#allocation3], 0  ;;  %v31_v10 = vld [vmem:[%s758_s0 + $0x20] sm:$0xff]  ;;  %v569_v11 = vpack.c.bf16 %v188_v9, %v187_v6  ;;  %566 = vmatprep.subr.bf16.mxu1 %v565_v8  ;;  %v32_v12 = vld [vmem:[%s758_s0 + $0x28] sm:$0xff]  ;;  %vm196_vm2 = vcmask 261120   ;;  %v619_v40 = vmov 0.0|0.0  }
   0x7   :  { %568 = vmatpush3.bf16.msra.mxu1 %v565_v8  ;;  %v33_v13 = vld [vmem:[%s758_s0 + $0x30] sm:$0xff]  ;;  %v34_v14 = vld [vmem:[%s758_s0 + $0x38] sm:$0xff]  ;;  %v454_v15 = vld [vmem:[%s760_s2] ss:$0 sm:$0xff]  ;;  %573 = vmatprep.subr.bf16.mxu0 %v619_v40  ;;  %vm620_vm3 = vmmov 0   ;;  %v621_v41 = vmov 0.0  }
   0x8   :  { %518 = vmatmul.mubr.msk.f32.gmra.mrb[2].mxu1 %vm43_vm1, %v30_v7  ;;  %570 = vmatprep.subr.bf16.mxu1 %v569_v11  ;;  %v335_v42 = vld [vmem:[%s764_s6] sm:$0x3]  ;;  %v622_v43 = vmov 0   ;;  %vm730_vm4 = vmpackc.low %vm196_vm2, %vm196_vm2  ;;  %s623_s29 = smov [#allocation2]   ;;  %vm438_vm5 = vcmask 517120  }
   0x9   :  { %520 = vmatprep.mubr.msk.f32.mxu1 %vm43_vm1, %v31_v10  ;;  %562 = vmatprep.mubr.msk.f32.mxu0 %vm620_vm3, %v621_v41  ;;  %v464_v44 = vld [vmem:[%s762_s4] ss:$0 sm:$0xff]  ;;  %s446_s30 = sshll.u32 %s623_s29, 4  ;;  %s447_s30 = int_to_ptr.vmem [resolvable:$true] %s446_s30 }
   0xa   :  { %594 = vset.pattern.permute.xlu0 %v622_v43  ;;  %v334_v10 = vld [vmem:[%s763_s5] sm:$0x3]  ;;  %s595_s8 = scalar_lea.vmem %s447_s30, 32  ;;  %p600_p1 = scmp.lt.s32.totalorder %s447_s30, %s447_s30 }
   0xb   :  { %572 = vmatpush3.bf16.msra.mxu1 %v569_v11  ;;  %338 = vperm.xlu0 %594, %v335_v42   ;;  %p596_p0 = scmp.ne.s32.totalorder %s447_s30, %s595_s8  ;;  %p601_p2 = scmp.lt.s32.totalorder %s595_s8, %s595_s8 }
   0xc   :  { %521 = vmatmul.mubr.msk.f32.gmra.mrb[4].mxu1 %vm43_vm1, %v32_v12 }
   0xd   :  { %523 = vmatprep.mubr.msk.f32.mxu1 %vm43_vm1, %v33_v13  ;;  %p602_p3 = por %p601_p2, %p600_p1 }
   0xf   :  { %p603_p4 = pnand %p602_p3, %p596_p0 }
  0x10   :  { %524 = vmatmul.mubr.msk.f32.gmra.mrb[6].mxu1 %vm43_vm1, %v34_v14 }
  0x8a   :  { %v339_v11 = vpop.permute.xlu0 %338 }
  0xd7   :  { %v516_v16 = vpop.f32.mrb[0].mxu1 }
  0xd8   :  { %v144_v17 = vadd.f32 %v516_v16, %v454_v15  ;;  %v138_v18 = vpop.f32.mrb[1].mxu1 }
  0xd9   :  { %v139_v19 = vadd.f32 %v454_v15, %v138_v18 }
  0xda   :  { %v178_v22 = vmax.f32 %v144_v17, 0.0 }
  0xdb   :  { %v177_v20 = vmax.f32 %v139_v19, 0.0  ;;  %v519_v21 = vpop.f32.mrb[2].mxu1 }
  0xdc   :  { %v154_v23 = vadd.f32 %v519_v21, %v454_v15  ;;  %v148_v24 = vpop.f32.mrb[3].mxu1 }
  0xdd   :  { %v149_v25 = vadd.f32 %v454_v15, %v148_v24  ;;  %534 = vmatprep.mubr.msk.f32.mxu1 %vm196_vm2, %v177_v20 }
  0xde   :  { %v180_v26 = vmax.f32 %v154_v23, 0.0  ;;  %535 = vmatmul.mubr.msk.f32.vlgmr.msra.gmra.mrb[8].mxu1 %vm196_vm2, %v178_v22 }
  0xdf   :  { %v179_v27 = vmax.f32 %v149_v25, 0.0  ;;  %v522_v28 = vpop.f32.mrb[4].mxu1 }
  0xe0   :  { %v164_v29 = vadd.f32 %v522_v28, %v454_v15  ;;  %v158_v30 = vpop.f32.mrb[5].mxu1 }
  0xe1   :  { %537 = vmatprep.mubr.msk.f32.mxu1 %vm196_vm2, %v179_v27  ;;  %v159_v31 = vadd.f32 %v454_v15, %v158_v30 }
  0xe2   :  { %538 = vmatmul.mubr.msk.f32.gmra.mrb[10].mxu1 %vm196_vm2, %v180_v26  ;;  %v182_v32 = vmax.f32 %v164_v29, 0.0 }
  0xe3   :  { %v181_v33 = vmax.f32 %v159_v31, 0.0  ;;  %v525_v34 = vpop.f32.mrb[6].mxu1 }
  0xe4   :  { %v174_v35 = vadd.f32 %v525_v34, %v454_v15  ;;  %v168_v36 = vpop.f32.mrb[7].mxu1 }
  0xe5   :  { %540 = vmatprep.mubr.msk.f32.mxu1 %vm196_vm2, %v181_v33  ;;  %v169_v37 = vadd.f32 %v454_v15, %v168_v36 }
  0xe6   :  { %541 = vmatmul.mubr.msk.f32.gmra.mrb[12].mxu1 %vm196_vm2, %v182_v32  ;;  %v184_v38 = vmax.f32 %v174_v35, 0.0 }
  0xe7   :  { %v183_v39 = vmax.f32 %v169_v37, 0.0 }
  0xe9   :  { %543 = vmatprep.mubr.msk.f32.mxu1 %vm196_vm2, %v183_v39 }
  0xea   :  { %544 = vmatmul.mubr.msk.f32.gmra.mrb[14].mxu1 %vm196_vm2, %v184_v38 }
 0x1b1   :  { %v536_v45 = vpop.f32.mrb[8].mxu1 }
 0x1b2   :  { %v293_v46 = vadd.f32 %v536_v45, %v464_v44  ;;  %v287_v47 = vpop.f32.mrb[9].mxu1 }
 0x1b3   :  { %v288_v48 = vadd.f32 %v464_v44, %v287_v47 }
 0x1b4   :  { %v327_v49 = vmax.f32 %v293_v46, 0.0 }
 0x1b5   :  { %v326_v50 = vmax.f32 %v288_v48, 0.0  ;;  %v539_v51 = vpop.f32.mrb[10].mxu1 }
 0x1b6   :  { %v303_v52 = vadd.f32 %v539_v51, %v464_v44  ;;  %v297_v53 = vpop.f32.mrb[11].mxu1 }
 0x1b7   :  { %v574_v55 = vpack.c.bf16 %v327_v49, %v326_v50  ;;  %v298_v56 = vadd.f32 %v464_v44, %v297_v53 }
 0x1b8   :  { %v329_v57 = vmax.f32 %v303_v52, 0.0 }
 0x1b9   :  { %v328_v58 = vmax.f32 %v298_v56, 0.0  ;;  %576 = vmatpush3.bf16.xpose.msk.msra.mxu0 %vm730_vm4, %v574_v55  ;;  %v542_v59 = vpop.f32.mrb[12].mxu1 }
 0x1ba   :  { %v313_v60 = vadd.f32 %v542_v59, %v464_v44  ;;  %v307_v61 = vpop.f32.mrb[13].mxu1  ;;  %577 = vmatprep.subr.bf16.mxu0 %v619_v40 }
 0x1bb   :  { %v578_v62 = vpack.c.bf16 %v329_v57, %v328_v58  ;;  %v308_v63 = vadd.f32 %v464_v44, %v307_v61 }
 0x1bc   :  { %v331_v0 = vmax.f32 %v313_v60, 0.0 }
 0x1bd   :  { %v330_v1 = vmax.f32 %v308_v63, 0.0  ;;  %v545_v2 = vpop.f32.mrb[14].mxu1 }
 0x1be   :  { %v323_v3 = vadd.f32 %v545_v2, %v464_v44  ;;  %v317_v4 = vpop.f32.mrb[15].mxu1 }
 0x1bf   :  { %v582_v5 = vpack.c.bf16 %v331_v0, %v330_v1  ;;  %v318_v6 = vadd.f32 %v464_v44, %v317_v4 }
 0x1c0   :  { %v333_v7 = vmax.f32 %v323_v3, 0.0 }
 0x1c1   :  { %580 = vmatpush3.bf16.xpose.msk.msra.mxu0 %vm730_vm4, %v578_v62  ;;  %v332_v8 = vmax.f32 %v318_v6, 0.0 }
 0x1c2   :  { %581 = vmatprep.subr.bf16.mxu0 %v619_v40 }
 0x1c3   :  { %v586_v9 = vpack.c.bf16 %v333_v7, %v332_v8 }
 0x1c9   :  { %584 = vmatpush3.bf16.xpose.msk.msra.mxu0 %vm730_vm4, %v582_v5 }
 0x1ca   :  { %585 = vmatprep.subr.bf16.mxu0 %v619_v40 }
 0x1d1   :  { %588 = vmatpush3.bf16.xpose.msk.msra.mxu0 %vm730_vm4, %v586_v9 }
 0x1d8   :  { %563 = vmatmul.mubr.msk.f32.vlgmr.msra.gmra.mrb[0].mxu0 %vm196_vm2, %v334_v10 }
 0x2ab   :  { %v434_v12 = vpop.f32.mrb[0].mxu0 }
 0x2ac   :  { %v435_v13 = vadd.f32 %v434_v12, %v339_v11  ;;  %v564_v14 = vpop.f32.mrb[1].mxu0 }
 0x2ae   :  { %439 = vst.msk [vmem:[#allocation2] sm:$0x3] %vm438_vm5, %v435_v13 }
 0x2af   :  { %606 = shalt.err (!%p603_p4)
}
 0x2b0   :  { %s607_s9 = scalar_lea.hbm %s765_s7, 32 }
 0x2b1   :  { %p608_p5 = scmp.ne.s32.totalorder %s765_s7, %s607_s9  ;;  %p611_p6 = scmp.lt.u32.totalorder %s607_s9, %s765_s7 }
 0x2b3   :  { %p613_p7 = pnand %p611_p6, %p608_p5 }
 0x2b5   :  { %616 = shalt.err (!%p613_p7)
}
 0x2b6   :  { %449 = dma.vmem_to_hbm [thread:$0]  %s447_s30, 32, %s765_s7, [#allocation3]  }
 0x2b7   :  { %617 = dma.done.wait [#allocation3], 32  }
 0x2b8   :  { %618 = vsyncadd [#allocation3], 4294967264 }
 0x2b9   :  { %453 = vsyncpa [#allocation3], 1 }

</bundles_post_ra>
